<compile_context>
chip_gen: v7x
topology: tpu7x:2x2x1
jax: 0.10.0
libtpu: 0.0.40
codegen_flags: <defaults>
</compile_context>

<pallas_src>
import functools

import jax
import jax.numpy as jnp
from jax.experimental import pallas as pl
from jax.experimental.pallas import tpu as pltpu


# ----------------------------------------------------------------------------
# Hardware-dependent budgets
# ----------------------------------------------------------------------------
_BUDGET_CACHE = None


def _vmem_budgets():
    """(scoped vmem limit, per-kernel tile working-set budget) in bytes."""
    global _BUDGET_CACHE
    if _BUDGET_CACHE is None:
        phys = 64 * 1024 * 1024                       # conservative default (v7x)
        try:
            info = pltpu.get_tpu_info()
            phys = int(getattr(info, "vmem_capacity_bytes", phys) or phys)
        except Exception:
            pass
        limit = min((phys * 3) // 4, 96 * 1024 * 1024)   # 96 MiB on v5e/v6e, 48 MiB on v7x
        budget = max(limit // 4, 4 * 1024 * 1024)
        _BUDGET_CACHE = (int(limit), int(budget))
    return _BUDGET_CACHE


def _round_up(x, m):
    return -(-x // m) * m


def _row_tile(M, row_bytes, budget):
    """Row tile for the 1x1 matmuls: biggest power-of-two tile that fits the
    VMEM budget, divides M and leaves >= 2 grid steps (megacore)."""
    cap = max(budget // max(row_bytes, 1), 128)
    for tm in (4096, 2048, 1024, 512, 256, 128):
        if tm <= cap and M % tm == 0 and M // tm >= 2:
            return tm, M
    tm = min(512, cap, _round_up(M, 8))
    tm = max((tm // 8) * 8, 8)
    return tm, _round_up(M, tm)


def _choose_th(N, H, W, Cp, budget):
    """Row tile for the fused bottleneck kernel.  Accounts for the weight
    blocks, Pallas double-buffers and the in-kernel f32 intermediates; keeps
    >= 2 total grid steps when the batch alone cannot feed both TCs."""
    max_th = H
    if N < 2 and H >= 2:
        max_th = H // 2
    best, best_aligned = 1, 0
    for th in range(1, max_th + 1):
        if H % th:
            continue
        # ~ in/out double-buffers + f32 t + padded bf16 t + f32 acc + patch
        vmem = 24 * th * W * Cp + 44 * Cp * Cp + (2 << 20)
        if vmem > budget:
            continue
        best = th
        if (th * W) % 8 == 0:
            best_aligned = th
    return best_aligned if best_aligned else best


def _pad_rows(x2d, m_pad):
    m = x2d.shape[0]
    if m_pad == m:
        return x2d
    return jnp.pad(x2d, ((0, m_pad - m), (0, 0)))


# ----------------------------------------------------------------------------
# Pallas kernels
# ----------------------------------------------------------------------------
def _leaky(y):
    return jnp.where(y > 0, y, 0.1 * y)            # LeakyReLU(0.1)


def _dual_1x1_kernel(x_ref, w_ref, b_ref, o1_ref, o2_ref, *, c_p):
    # cv1 and cv2 share the input tile and the matmul: one (tm,Cin)@(Cin,2c_)
    # MXU push per tile, outputs split on a 128-lane boundary (lane-dense).
    y = jnp.dot(x_ref[...], w_ref[...], preferred_element_type=jnp.float32)
    y = _leaky(y + b_ref[...])
    o1_ref[...] = y[:, :c_p].astype(o1_ref.dtype)
    o2_ref[...] = y[:, c_p:].astype(o2_ref.dtype)


def _cv3_kernel(y_ref, y2_ref, w_ref, b_ref, o_ref):
    # cv3(concat(y, y2)): concat happens on lanes in VMEM, single K=2c_ dot.
    x = jnp.concatenate([y_ref[...], y2_ref[...]], axis=-1)
    z = jnp.dot(x, w_ref[...], preferred_element_type=jnp.float32)
    o_ref[...] = _leaky(z + b_ref[...]).astype(o_ref.dtype)


def _bottleneck_kernel(y_ref, ytop_ref, ybot_ref, w1_ref, b1_ref, w3_ref, b3_ref,
                       o_ref, *, th, W, shortcut):
    """Fused Bottleneck: 1x1 conv on (tile + row halos) -> zero-pad in VMEM ->
    3x3 conv as 9 shifted matmuls -> BN/LeakyReLU -> residual add."""
    i = pl.program_id(1)
    nH = pl.num_programs(1)
    Cp = y_ref.shape[-1]

    # ---- m.cv1 (1x1) on the row tile plus its two halo rows (t never in HBM) ----
    yfull = jnp.concatenate([ytop_ref[0], y_ref[0], ybot_ref[0]], axis=0)   # (th+2, W, Cp)
    t = jnp.dot(yfull.reshape((th + 2) * W, Cp), w1_ref[...],
                preferred_element_type=jnp.float32)
    t = _leaky(t + b1_ref[...])

    # Halo rows outside the image must be zero (the 3x3 zero-padding acts on t,
    # not on y).  At the image boundary the halo view is a clamped duplicate
    # row -> overwrite its t with zeros.
    r = jax.lax.broadcasted_iota(jnp.int32, ((th + 2) * W, 1), 0)
    keep = jnp.logical_and(jnp.logical_or(i != 0, r >= W),
                           jnp.logical_or(i != nH - 1, r < (th + 1) * W))
    t = jnp.where(keep, t, 0.0).astype(jnp.bfloat16).reshape(th + 2, W, Cp)

    # Zero-pad the width by 1 on each side, in VMEM only.
    zcol = jnp.zeros((th + 2, 1, Cp), jnp.bfloat16)
    tpad = jnp.concatenate([zcol, t, zcol], axis=1)                         # (th+2, W+2, Cp)

    # ---- m.cv2 (3x3, pad=1): 9 shifted matmuls, f32 accumulation ----
    acc = jnp.zeros((th * W, Cp), jnp.float32)
    for kh in range(3):
        for kw in range(3):
            patch = tpad[kh:kh + th, kw:kw + W, :].reshape(th * W, Cp)
            acc = acc + jnp.dot(patch, w3_ref[kh * 3 + kw],
                                preferred_element_type=jnp.float32)

    out = _leaky(acc + b3_ref[...]).reshape(th, W, Cp)
    if shortcut:
        out = out + y_ref[0].astype(jnp.float32)                            # fused residual
    o_ref[0] = out.astype(o_ref.dtype)


# ----------------------------------------------------------------------------
# Kernel wrappers
# ----------------------------------------------------------------------------
def _cparams(sem, limit):
    return pltpu.CompilerParams(dimension_semantics=sem, vmem_limit_bytes=limit)


def conv1x1_dual(x2d, w12, b12, c_p, budget, limit):
    """Fused cv1 + cv2: one matmul against the merged (Cin, 2*c_) weight."""
    M, C1 = x2d.shape
    row_bytes = 4 * C1 + 28 * c_p
    tm, Mp = _row_tile(M, row_bytes, budget)
    xp = _pad_rows(x2d, Mp)
    y1, y2 = pl.pallas_call(
        functools.partial(_dual_1x1_kernel, c_p=c_p),
        out_shape=(jax.ShapeDtypeStruct((Mp, c_p), jnp.bfloat16),
                   jax.ShapeDtypeStruct((Mp, c_p), jnp.bfloat16)),
        grid_spec=pltpu.PrefetchScalarGridSpec(
            num_scalar_prefetch=0, grid=(Mp // tm,),
            in_specs=[pl.BlockSpec((tm, C1), lambda i: (i, 0)),
                      pl.BlockSpec((C1, 2 * c_p), lambda i: (0, 0)),
                      pl.BlockSpec((1, 2 * c_p), lambda i: (0, 0))],
            out_specs=[pl.BlockSpec((tm, c_p), lambda i: (i, 0)),
                       pl.BlockSpec((tm, c_p), lambda i: (i, 0))]),
        compiler_params=_cparams(("parallel",), limit),
    )(xp, w12, b12)
    return y1[:M], y2[:M]


def conv1x1_concat(y_2d, y2_2d, w, b, budget, limit):
    """cv3 with torch.cat fused: one K=2*c_ matmul on the VMEM concat."""
    M, c_p = y_2d.shape
    c2_p = w.shape[1]
    row_bytes = 8 * c_p + 12 * c2_p
    tm, Mp = _row_tile(M, row_bytes, budget)
    out = pl.pallas_call(
        _cv3_kernel,
        out_shape=jax.ShapeDtypeStruct((Mp, c2_p), jnp.bfloat16),
        grid_spec=pltpu.PrefetchScalarGridSpec(
            num_scalar_prefetch=0, grid=(Mp // tm,),
            in_specs=[pl.BlockSpec((tm, c_p), lambda i: (i, 0)),
                      pl.BlockSpec((tm, c_p), lambda i: (i, 0)),
                      pl.BlockSpec((2 * c_p, c2_p), lambda i: (0, 0)),
                      pl.BlockSpec((1, c2_p), lambda i: (0, 0))],
            out_specs=pl.BlockSpec((tm, c2_p), lambda i: (i, 0))),
        compiler_params=_cparams(("parallel",), limit),
    )(_pad_rows(y_2d, Mp), _pad_rows(y2_2d, Mp), w, b)
    return out[:M]


def bottleneck_fused(y, w1, b1, w3, b3, *, shortcut, budget, limit):
    """One Bottleneck(c_, c_, e=1.0): fused 1x1 + 3x3(pad=1) + BN + LeakyReLU
    + residual.  Row halos come from two extra 1-row views of the same input
    (clamped index_maps) so everything is auto double-buffered by Pallas."""
    N, H, W, Cp = y.shape
    th = _choose_th(N, H, W, Cp, budget)
    nH = H // th

    main_map = lambda nn, i: (nn, i, 0, 0)
    halo_top = lambda nn, i: (nn, jnp.maximum(i * th - 1, 0), 0, 0)
    halo_bot = lambda nn, i: (nn, jnp.minimum(i * th + th, H - 1), 0, 0)

    kernel = functools.partial(_bottleneck_kernel, th=th, W=W, shortcut=shortcut)
    return pl.pallas_call(
        kernel,
        out_shape=jax.ShapeDtypeStruct((N, H, W, Cp), y.dtype),
        grid_spec=pltpu.PrefetchScalarGridSpec(
            num_scalar_prefetch=0, grid=(N, nH),
            in_specs=[pl.BlockSpec((1, th, W, Cp), main_map),
                      pl.BlockSpec((1, 1, W, Cp), halo_top),
                      pl.BlockSpec((1, 1, W, Cp), halo_bot),
                      pl.BlockSpec((Cp, Cp), lambda nn, i: (0, 0)),
                      pl.BlockSpec((1, Cp), lambda nn, i: (0, 0)),
                      pl.BlockSpec((9, Cp, Cp), lambda nn, i: (0, 0, 0)),
                      pl.BlockSpec((1, Cp), lambda nn, i: (0, 0))],
            out_specs=pl.BlockSpec((1, th, W, Cp), main_map)),
        compiler_params=_cparams(("parallel", "parallel"), limit),
    )(y, y, y, w1, b1, w3, b3)


# ----------------------------------------------------------------------------
# Parameter folding (BN scale -> weights) and lane padding
# ----------------------------------------------------------------------------
def _fold_pad_1x1(w, scale, shift, cin_pad=None, cout_pad=None):
    cin, cout = w.shape
    cin_p = cin if cin_pad is None else cin_pad
    cout_p = cout if cout_pad is None else cout_pad
    wf = w * scale                                            # fold BN scale (f32)
    wp = jnp.zeros((cin_p, cout_p), jnp.float32).at[:cin, :cout].set(wf)
    bp = jnp.zeros((1, cout_p), jnp.float32).at[:, :cout].set(shift)
    return wp.astype(jnp.bfloat16), bp


def _fold_pad_3x3(w, scale, shift, cp):
    kh, kw, cin, cout = w.shape
    wf = w * scale
    wp = jnp.zeros((kh, kw, cp, cp), jnp.float32).at[:, :, :cin, :cout].set(wf)
    bp = jnp.zeros((1, cp), jnp.float32).at[:, :cout].set(shift)
    return wp.reshape(kh * kw, cp, cp).astype(jnp.bfloat16), bp


# ----------------------------------------------------------------------------
# Parameters (deterministic, synthetic) and module forward
# ----------------------------------------------------------------------------
def make_conv_params(key, cin, cout, k):
    k1, k2, k3, k4, k5 = jax.random.split(key, 5)
    if k == 1:
        w = jax.random.normal(k1, (cin, cout), jnp.float32) * 0.2
    else:
        w = jax.random.normal(k1, (k, k, cin, cout), jnp.float32) * 0.2
    gamma = jax.random.uniform(k2, (cout,), jnp.float32, 0.5, 1.5)
    beta = jax.random.normal(k3, (cout,), jnp.float32) * 0.1
    mean = jax.random.normal(k4, (cout,), jnp.float32) * 0.1
    var = jax.random.uniform(k5, (cout,), jnp.float32, 0.5, 1.5)
    scale = gamma / jnp.sqrt(var + 1e-5)                      # BatchNorm2d eps = 1e-5
    shift = beta - mean * scale
    return w, scale.reshape(1, cout), shift.reshape(1, cout)


def make_csp_params(key, c1, c2, n=1, e=0.5):
    c_ = int(c2 * e)
    keys = jax.random.split(key, 3 + 2 * n)
    p = {
        "cv1": make_conv_params(keys[0], c1, c_, 1),
        "cv2": make_conv_params(keys[1], c1, c_, 1),
        "cv3": make_conv_params(keys[2], 2 * c_, c2, 1),
    }
    for i in range(n):
        # Bottleneck(c_, c_, e=1.0): cv1 1x1 (c_->c_), cv2 3x3 p=1 (c_->c_)
        p[f"m{i}_cv1"] = make_conv_params(keys[3 + 2 * i], c_, c_, 1)
        p[f"m{i}_cv2"] = make_conv_params(keys[4 + 2 * i], c_, c_, 3)
    return p


def bottleneck_csp_forward(x_nchw, params, n=1, shortcut=True):
    limit, budget = _vmem_budgets()
    x = jnp.transpose(x_nchw, (0, 2, 3, 1)).astype(jnp.bfloat16)   # NCHW -> NHWC bf16
    N, H, W, C1 = x.shape
    M = N * H * W

    c_ = params["cv1"][0].shape[1]
    c2 = params["cv3"][0].shape[1]
    c_p = _round_up(c_, 128)                                   # lane-dense internal width
    c2_p = _round_up(c2, 128)

    # --- fold BN scale into bf16 weights, zero-pad channels to lane width ---
    w1p, b1p = _fold_pad_1x1(*params["cv1"], cout_pad=c_p)
    w2p, b2p = _fold_pad_1x1(*params["cv2"], cout_pad=c_p)
    w12 = jnp.concatenate([w1p, w2p], axis=1)                  # (C1, 2*c_p)
    b12 = jnp.concatenate([b1p, b2p], axis=1)                  # (1, 2*c_p)

    mparams = []
    for i in range(n):
        wa, ba = _fold_pad_1x1(*params[f"m{i}_cv1"], cin_pad=c_p, cout_pad=c_p)
        wb, bb = _fold_pad_3x3(*params[f"m{i}_cv2"], c_p)
        mparams.append((wa, ba, wb, bb))

    w3c, s3c, sh3c = params["cv3"]
    wf3 = w3c * s3c                                            # (2*c_, c2) folded
    w_cv3 = jnp.zeros((2 * c_p, c2_p), jnp.float32)
    w_cv3 = w_cv3.at[:c_, :c2].set(wf3[:c_]).at[c_p:c_p + c_, :c2].set(wf3[c_:])
    w_cv3 = w_cv3.astype(jnp.bfloat16)
    b_cv3 = jnp.zeros((1, c2_p), jnp.float32).at[:, :c2].set(sh3c)

    # --- cv1 & cv2 : one fused pass over x ---
    y1, y2 = conv1x1_dual(x.reshape(M, C1), w12, b12, c_p, budget, limit)

    # --- bottleneck chain : m.cv1 + m.cv2(3x3) + residual fused per iteration ---
    y = y1.reshape(N, H, W, c_p)
    for i in range(n):
        wa, ba, wb, bb = mparams[i]
        y = bottleneck_fused(y, wa, ba, wb, bb, shortcut=shortcut,
                             budget=budget, limit=limit)

    # --- cv3(torch.cat((y, y2), dim=1)) with the concat folded into the matmul ---
    out = conv1x1_concat(y.reshape(M, c_p), y2, w_cv3, b_cv3, budget, limit)
    out = out[:M, :c2].reshape(N, H, W, c2)
    return jnp.transpose(out, (0, 3, 1, 2)).astype(jnp.float32)     # back to NCHW


# ----------------------------------------------------------------------------
# Pure-JAX reference (mirrors the kernels' bf16/f32 quantization points)
# ----------------------------------------------------------------------------
def _ref_conv(x_bf16, w, scale, shift, k, act=True):
    wf = (w * scale).astype(jnp.bfloat16)                      # scale folded, like kernels
    if k == 1:
        w4 = wf.reshape(1, 1, w.shape[0], w.shape[1])
        pad = "VALID"
    else:
        w4 = wf
        pad = ((1, 1), (1, 1))
    y = jax.lax.conv_general_dilated(x_bf16, w4, (1, 1), pad,
                                     dimension_numbers=("NHWC", "HWIO", "NHWC"),
                                     preferred_element_type=jnp.float32)
    y = y + shift.reshape(1, 1, 1, -1)
    if act:
        y = jnp.where(y > 0, y, 0.1 * y)
    return y                                                   # f32


def _ref_forward(x_nchw, params, n=1, shortcut=True):
    x = jnp.transpose(x_nchw, (0, 2, 3, 1)).astype(jnp.bfloat16)
    y = _ref_conv(x, *params["cv1"], k=1).astype(jnp.bfloat16)
    y2 = _ref_conv(x, *params["cv2"], k=1).astype(jnp.bfloat16)
    for i in range(n):
        t = _ref_conv(y, *params[f"m{i}_cv1"], k=1).astype(jnp.bfloat16)
        t3 = _ref_conv(t, *params[f"m{i}_cv2"], k=3)
        y = (t3 + y.astype(jnp.float32)) if shortcut else t3
        y = y.astype(jnp.bfloat16)
    cat = jnp.concatenate([y, y2], axis=-1)
    out = _ref_conv(cat, *params["cv3"], k=1).astype(jnp.bfloat16)
    return jnp.transpose(out, (0, 3, 1, 2)).astype(jnp.float32)


# ----------------------------------------------------------------------------
if __name__ == "__main__":
    c1, c2, n = 4, 4, 1
    N, H, W = 2, 16, 16

    key = jax.random.PRNGKey(0)
    kx, kp = jax.random.split(key)
    x = jax.random.normal(kx, (N, c1, H, W), jnp.float32)      # NCHW, like PyTorch
    params = make_csp_params(kp, c1, c2, n=n, e=0.5)

    out = bottleneck_csp_forward(x, params, n=n, shortcut=True)
    out = jax.block_until_ready(out)

    ref = jax.block_until_ready(_ref_forward(x, params, n=n, shortcut=True))
    assert out.shape == (N, c2, H, W), out.shape
    assert jnp.allclose(out, ref, atol=2e-2, rtol=2e-2), \
        f"mismatch vs reference, max |diff| = {float(jnp.max(jnp.abs(out - ref)))}"

    print("KERNEL_OK")
</pallas_src>

<mosaic_0001>
module attributes {stable_mosaic.version = 11 : i64} {
  func.func @_dual_1x1_kernel(%arg0: i32, %arg1: memref<256x4xbf16, #tpu.memory_space<vmem>>, %arg2: memref<4x256xbf16, #tpu.memory_space<vmem>>, %arg3: memref<1x256xf32, #tpu.memory_space<vmem>>, %arg4: memref<256x128xbf16, #tpu.memory_space<vmem>>, %arg5: memref<256x128xbf16, #tpu.memory_space<vmem>>) attributes {dimension_semantics = [#tpu.dimension_semantics<parallel>], iteration_bounds = array<i64: 2>, scalar_prefetch = 0 : i64, scratch_operands = 0 : i64, tpu.core_type = #tpu.core_type<tc>, window_params = [{transform_indices = @transform_0, window_bounds = array<i64: 256, 4>}, {pipeline_mode = #tpu.pipeline_mode<synchronous>, transform_indices = @transform_1, window_bounds = array<i64: 4, 256>}, {pipeline_mode = #tpu.pipeline_mode<synchronous>, transform_indices = @transform_2, window_bounds = array<i64: 1, 256>}, {transform_indices = @transform_3, window_bounds = array<i64: 256, 128>}, {transform_indices = @transform_4, window_bounds = array<i64: 256, 128>}]} {
    %c0 = arith.constant 0 : index
    %c0_0 = arith.constant 0 : index
    %0 = vector.load %arg1[%c0, %c0_0] : memref<256x4xbf16, #tpu.memory_space<vmem>>, vector<256x4xbf16>
    %c0_1 = arith.constant 0 : index
    %c0_2 = arith.constant 0 : index
    %1 = vector.load %arg2[%c0_1, %c0_2] : memref<4x256xbf16, #tpu.memory_space<vmem>>, vector<4x256xbf16>
    %cst = arith.constant dense<0.000000e+00> : vector<256x256xf32>
    %2 = tpu.matmul %0, %1, %cst {dimension_numbers = #tpu.dot_dimension_numbers<[1], [0], [0], [1], [0, 0, 1, 1], [], []>} : vector<256x4xbf16>, vector<4x256xbf16>, vector<256x256xf32> -> vector<256x256xf32>
    %c0_3 = arith.constant 0 : index
    %c0_4 = arith.constant 0 : index
    %3 = vector.load %arg3[%c0_3, %c0_4] : memref<1x256xf32, #tpu.memory_space<vmem>>, vector<1x256xf32>
    %4 = vector.broadcast %3 : vector<1x256xf32> to vector<256x256xf32>
    %5 = arith.addf %2, %4 : vector<256x256xf32>
    %cst_5 = arith.constant 0.000000e+00 : f32
    %6 = vector.broadcast %cst_5 : f32 to vector<256x256xf32>
    %7 = arith.cmpf ogt, %5, %6 : vector<256x256xf32>
    %cst_6 = arith.constant 1.000000e-01 : f32
    %8 = vector.broadcast %cst_6 : f32 to vector<256x256xf32>
    %9 = arith.mulf %8, %5 : vector<256x256xf32>
    %10 = arith.select %7, %5, %9 : vector<256x256xi1>, vector<256x256xf32>
    %11 = vector.extract_strided_slice %10 {offsets = [0, 0], sizes = [256, 128], strides = [1, 1]} : vector<256x256xf32> to vector<256x128xf32>
    %12 = arith.truncf %11 : vector<256x128xf32> to vector<256x128xbf16>
    %c0_7 = arith.constant 0 : index
    %c0_8 = arith.constant 0 : index
    %13 = vector.load %arg4[%c0_7, %c0_8] : memref<256x128xbf16, #tpu.memory_space<vmem>>, vector<256x128xbf16>
    tpu.vector_store %arg4[%c0_7, %c0_8], %12 {strides = array<i32>} : memref<256x128xbf16, #tpu.memory_space<vmem>>, vector<256x128xbf16>,
    %14 = vector.extract_strided_slice %10 {offsets = [0, 128], sizes = [256, 128], strides = [1, 1]} : vector<256x256xf32> to vector<256x128xf32>
    %15 = arith.truncf %14 : vector<256x128xf32> to vector<256x128xbf16>
    %c0_9 = arith.constant 0 : index
    %c0_10 = arith.constant 0 : index
    %16 = vector.load %arg5[%c0_9, %c0_10] : memref<256x128xbf16, #tpu.memory_space<vmem>>, vector<256x128xbf16>
    tpu.vector_store %arg5[%c0_9, %c0_10], %15 {strides = array<i32>} : memref<256x128xbf16, #tpu.memory_space<vmem>>, vector<256x128xbf16>,
    return
  }
  func.func @transform_0(%arg0: i32) -> (i32, i32) {
    %c0_i32 = arith.constant 0 : i32
    %c0_i32_0 = arith.constant 0 : i32
    return %arg0, %c0_i32 : i32, i32
  }
  func.func @transform_1(%arg0: i32) -> (i32, i32) {
    %c0_i32 = arith.constant 0 : i32
    %c0_i32_0 = arith.constant 0 : i32
    %c0_i32_1 = arith.constant 0 : i32
    return %c0_i32, %c0_i32_0 : i32, i32
  }
  func.func @transform_2(%arg0: i32) -> (i32, i32) {
    %c0_i32 = arith.constant 0 : i32
    %c0_i32_0 = arith.constant 0 : i32
    %c0_i32_1 = arith.constant 0 : i32
    return %c0_i32, %c0_i32_0 : i32, i32
  }
  func.func @transform_3(%arg0: i32) -> (i32, i32) {
    %c0_i32 = arith.constant 0 : i32
    %c0_i32_0 = arith.constant 0 : i32
    return %arg0, %c0_i32 : i32, i32
  }
  func.func @transform_4(%arg0: i32) -> (i32, i32) {
    %c0_i32 = arith.constant 0 : i32
    %c0_i32_0 = arith.constant 0 : i32
    return %arg0, %c0_i32 : i32, i32
  }
}

</mosaic_0001>

<bundles_post_ra>
// kernel: tpu_custom_call.1
= control target key start
LH: loop header
LB: loop body
LE: loop exit
PB: predicated region body
PF: predicated region fallthrough
CT: control target
= control target key end

     0   :  { %10 = vsyncpa [#allocation3], 0  ;;  %s2097_s0 = inlined_call_operand.vmem [shape: bf16[512,4], index: 0, kind: input, shape index: {}]   ;;  %s2098_s1 = inlined_call_operand.vmem [shape: bf16[4,256], index: 1, kind: input, shape index: {}]   ;;  %s2099_s2 = inlined_call_operand.vmem [shape: f32[1,256], index: 2, kind: input, shape index: {}]   ;;  %s2100_s3 = inlined_call_operand.hbm [shape: bf16[512,128], index: 3, kind: output, shape index: {0}]   ;;  %s2101_s4 = inlined_call_operand.hbm [shape: bf16[512,128], index: 4, kind: output, shape index: {1}]  }
   0x1   :  { %12 = vsyncpa [#allocation3 + $0x1], 0 }
   0x2   :  { %13 = vsyncpa [#allocation5], 0 }
   0x3   :  { %15 = vsyncpa [#allocation5 + $0x1], 0  ;;  %s1797_s15 = smov 0   ;;  %s1799_s16 = smov 0  }
   0x4   :  { %s1801_s17 = smov 0   ;;  %s1803_s18 = smov 0  }
   0x5 LB: > { %s1818_s19 = sadd.s32 4294967295, %s1765_s18   ;;  %s1236_s20 = sadd.s32 4294967294, %s1765_s18   ;;  %s1765_s18 = sphi %s1803_s18, %s2107_s18   ;;  %s1761_s17 = sphi %s1801_s17, %s2106_s17   ;;  %s1757_s16 = sphi %s1799_s16, %s2105_s16   ;;  %s1753_s15 = sphi %s1797_s15, %s2104_s15  }
   0x6   : > { %s1822_s21 = sadd.s32 1, %s1765_s18   ;;  %s96_s22 = sadd.s32 1, %s1761_s17 }
   0x7   : > { %s93_s23 = ssub.s32 %s1765_s18, %s1822_s21  ;;  %p106_p0 = scmp.ne.s32.totalorder %s1761_s17, %s1757_s16 }
   0x8   : > { %p94_p1 = scmp.eq.s32.totalorder %s93_s23, 0  ;;  %p107_p2 = scmp.eq.s32.totalorder %s1818_s19, 1 }
   0x9   : > { %p112_p3 = scmp.ne.s32.totalorder %s1757_s16, %s1753_s15  ;;  %p113_p4 = scmp.eq.s32.totalorder %s1236_s20, 1 }
   0xa   : > { %s1833_s24 = scalar_select %p94_p1, %s1761_s17, %s96_s22  }
   0xb   : > { %p1835_p5 = por %p107_p2, %p106_p0  ;;  %p1839_p6 = por %p113_p4, %p112_p3 }
   0xc   : > { %p1239_p7 = scmp.ge.s32.totalorder %s1765_s18, 1  ;;  %p172_p8 = scmp.lt.s32.totalorder %s1765_s18, 3 }
   0xe   : > { %p173_p9 = pnand %p1239_p7, %p172_p8 }
   0xf   : > { %v1260_v0 = vld.sshfl [vmem:[%s2098_s1] sm:$0x33 pattern:$0x76325410] (!%p173_p9)  ;;  %vm395_vm0 = vcmask (!%p173_p9), 1041408   ;;  %v1767_v3 = vmov (!%p173_p9), 0   ;;  %v247_v20 = vlaneseq (!%p173_p9) }
  0x10   : > { %176 = sbr.rel (%p173_p9) target bundleno = 352 (0x160), region = 32  ;;  %v345_v1 = vcombine.high (!%p173_p9), %v1260_v0, %v1260_v0  ;;  %v397_v2 = vsel (!%p173_p9), %vm395_vm0, %v1260_v0, 0  ;;  %434 = vmatprep.mubr.bf16.mxu0 (!%p173_p9), %v1767_v3  ;;  %514 = vmatprep.mubr.bf16.mxu1 (!%p173_p9), %v1767_v3  ;;  %s1242_s29 = sshll.u32 (!%p173_p9), %s1818_s19, 5  ;;  %vm346_vm1 = vcmask (!%p173_p9), 31744   ;;  %v245_v23 = vld [vmem:[%s2099_s2] sm:$0x3] (!%p173_p9) }
  0x11   : > { %p204_p10 = scmp.lt.s32.totalorder (!%p173_p9), %s1242_s29, 63  ;;  %v248_v21 = vshrl.u32 (!%p173_p9), %v247_v20, 7  ;;  %s1897_s10 = sand.u32 (!%p173_p9), 1, %s1757_s16  }
  0x12   : > { %1261 = vmatprep.subr.msk.bf16.mxu0 (!%p173_p9), %vm395_vm0, %v345_v1  ;;  %1606 = vmatprep.subr.msk.bf16.mxu1 (!%p173_p9), %vm395_vm0, %v345_v1  ;;  %s1240_s11 = sshll.u32 (!%p173_p9), %s1897_s10, 7  ;;  %s1414_s14 = sshll.u32 (!%p173_p9), %s1818_s19, 11 }
  0x13   : > { %403 = vmatpush1.bf16.msra.mxu0 (!%p173_p9), %v397_v2  ;;  %1607 = vmatpush1.bf16.msra.mxu1 (!%p173_p9), %v397_v2  ;;  %v249_v22 = vsub.s32 (!%p173_p9), 0, %v248_v21  ;;  %v253_v24 = vsub.s32 (!%p173_p9), 1, %v248_v21  ;;  %s1909_s12 = scalar_lea.vmem (!%p173_p9), [#allocation2], %s1240_s11  ;;  %s1918_s13 = scalar_lea.vmem (!%p173_p9), [#allocation4], %s1240_s11 }
  0x14   : > { %s1126_s20 = sshll.u32 (!%p173_p9), %s1909_s12, 4  ;;  %s2007_s27 = scalar_lea.hbm (!%p173_p9), %s2100_s3, %s1414_s14  ;;  %s2009_s20 = int_to_ptr.vmem [resolvable:$true] %s1126_s20 }
  0x15   : > { %v1889_v25 = vrot.slane (!%p173_p9), %v245_v23, %v249_v22  ;;  %v1891_v26 = vrot.slane (!%p173_p9), %v245_v23, %v253_v24  ;;  %s1142_s28 = sshll.u32 (!%p173_p9), %s1918_s13, 4  ;;  %s2020_s5 = scalar_lea.hbm (!%p173_p9), %s2101_s4, %s1414_s14  ;;  %s2022_s28 = int_to_ptr.vmem [resolvable:$true] %s1142_s28 }
  0x16   : > { %s1108_s6 = scalar_lea.sflag (!%p173_p9), [#allocation3], %s1897_s10  ;;  %s1768_s8 = smov (!%p173_p9), [#allocation2]  }
  0x17   : > { %s2109_s29 = smov (!%p204_p10, %s1242_s29), 63  ;;  %s1675_s9 = sshll.u32 %s1768_s8, 4  ;;  %s1676_s9 = int_to_ptr.vmem [resolvable:$false] %s1675_s9 }
  0x18   : > { %s1243_s30 = sshll.u32 %s2109_s29, 2  ;;  %s1677_s11 = scalar_lea.vmem %s1676_s9, 4096 }
  0x19   : > { %s1852_s7 = scalar_lea.vmem %s2097_s0, %s1243_s30  ;;  %p1678_p0 = scmp.lt.s32.totalorder %s2009_s20, %s1676_s9 }
  0x1a   : > { %v1655_v4 = vld [vmem:[%s1852_s7] sm:$0xff]   ;;  %v1657_v6 = vld [vmem:[%s1852_s7 + $0x8] sm:$0xff]   ;;  %v1659_v8 = vld [vmem:[%s1852_s7 + $0x10] sm:$0xff]  }
  0x1b   : > { %v1656_v5 = vld [vmem:[%s1852_s7 + $0x40] sm:$0xff]   ;;  %1262 = vmatmul.mubr.msk.bf16.vlgmr.msra.gmra.mrb[0].mxu0 %vm346_vm1, %v1655_v4  ;;  %v1658_v7 = vld [vmem:[%s1852_s7 + $0x48] sm:$0xff]   ;;  %v1660_v9 = vld [vmem:[%s1852_s7 + $0x50] sm:$0xff]  }
  0x1c   : > { %1270 = vmatmul.mubr.msk.bf16.vlgmr.msra.gmra.mrb[0].mxu1 %vm346_vm1, %v1656_v5  ;;  %444 = vmatprep.mubr.bf16.mxu0 %v1767_v3  ;;  %v1661_v10 = vld [vmem:[%s1852_s7 + $0x18] sm:$0xff]   ;;  %v1663_v12 = vld [vmem:[%s1852_s7 + $0x20] sm:$0xff]   ;;  %v1665_v14 = vld [vmem:[%s1852_s7 + $0x28] sm:$0xff]  }
  0x1d   : > { %524 = vmatprep.mubr.bf16.mxu1 %v1767_v3  ;;  %v1662_v11 = vld [vmem:[%s1852_s7 + $0x58] sm:$0xff]   ;;  %v1664_v13 = vld [vmem:[%s1852_s7 + $0x60] sm:$0xff]   ;;  %v1666_v15 = vld [vmem:[%s1852_s7 + $0x68] sm:$0xff]  }
  0x1e   : > { %v1667_v16 = vld [vmem:[%s1852_s7 + $0x30] sm:$0xff]   ;;  %v1669_v18 = vld [vmem:[%s1852_s7 + $0x38] sm:$0xff]  }
  0x1f   : > { %v1668_v17 = vld [vmem:[%s1852_s7 + $0x70] sm:$0xff]   ;;  %v1670_v19 = vld [vmem:[%s1852_s7 + $0x78] sm:$0xff]   ;;  %s1671_s7 = scalar_lea.vmem %s2009_s20, 2048 }
  0x20   : > { %p1672_p11 = scmp.ne.s32.totalorder %s2009_s20, %s1671_s7  ;;  %p1679_p1 = scmp.lt.s32.totalorder %s1677_s11, %s1671_s7 }
  0x22   : > { %p1673_p12 = pnand %p1672_p11, %p1835_p5  ;;  %p1680_p2 = por %p1679_p1, %p1678_p0 }
  0x23   : > { %1263 = vmatmul.mubr.msk.bf16.gmra.mrb[4].mxu0 %vm346_vm1, %v1657_v6 }
  0x24   : > { %1271 = vmatmul.mubr.msk.bf16.gmra.mrb[4].mxu1 %vm346_vm1, %v1658_v7  ;;  %454 = vmatprep.mubr.bf16.mxu0 %v1767_v3  ;;  %p1674_p13 = pneg %p1673_p12 }
  0x25   : > { %534 = vmatprep.mubr.bf16.mxu1 %v1767_v3 }
  0x26   : > { %p1681_p3 = pnand %p1680_p2, %p1674_p13 }
  0x2b   : > { %1264 = vmatmul.mubr.msk.bf16.gmra.mrb[8].mxu0 %vm346_vm1, %v1659_v8 }
  0x2c   : > { %1272 = vmatmul.mubr.msk.bf16.gmra.mrb[8].mxu1 %vm346_vm1, %v1660_v9  ;;  %464 = vmatprep.mubr.bf16.mxu0 %v1767_v3 }
  0x2d   : > { %544 = vmatprep.mubr.bf16.mxu1 %v1767_v3 }
  0x33   : > { %1265 = vmatmul.mubr.msk.bf16.gmra.mrb[12].mxu0 %vm346_vm1, %v1661_v10 }
  0x34   : > { %1273 = vmatmul.mubr.msk.bf16.gmra.mrb[12].mxu1 %vm346_vm1, %v1662_v11  ;;  %474 = vmatprep.mubr.bf16.mxu0 %v1767_v3 }
  0x35   : > { %554 = vmatprep.mubr.bf16.mxu1 %v1767_v3 }
  0x3b   : > { %1266 = vmatmul.mubr.msk.bf16.gmra.mrb[16].mxu0 %vm346_vm1, %v1663_v12 }
  0x3c   : > { %1274 = vmatmul.mubr.msk.bf16.gmra.mrb[16].mxu1 %vm346_vm1, %v1664_v13  ;;  %484 = vmatprep.mubr.bf16.mxu0 %v1767_v3 }
  0x3d   : > { %564 = vmatprep.mubr.bf16.mxu1 %v1767_v3 }
  0x43   : > { %1267 = vmatmul.mubr.msk.bf16.gmra.mrb[20].mxu0 %vm346_vm1, %v1665_v14 }
  0x44   : > { %1275 = vmatmul.mubr.msk.bf16.gmra.mrb[20].mxu1 %vm346_vm1, %v1666_v15  ;;  %494 = vmatprep.mubr.bf16.mxu0 %v1767_v3 }
  0x45   : > { %574 = vmatprep.mubr.bf16.mxu1 %v1767_v3 }
  0x4b   : > { %1268 = vmatmul.mubr.msk.bf16.gmra.mrb[24].mxu0 %vm346_vm1, %v1667_v16 }
  0x4c   : > { %1276 = vmatmul.mubr.msk.bf16.gmra.mrb[24].mxu1 %vm346_vm1, %v1668_v17  ;;  %504 = vmatprep.mubr.bf16.mxu0 %v1767_v3 }
  0x4d   : > { %584 = vmatprep.mubr.bf16.mxu1 %v1767_v3 }
  0x53   : > { %1269 = vmatmul.mubr.msk.bf16.gmra.mrb[28].mxu0 %vm346_vm1, %v1669_v18 }
  0x54   : > { %1277 = vmatmul.mubr.msk.bf16.gmra.mrb[28].mxu1 %vm346_vm1, %v1670_v19 }
  0xee   : > { %v436_v27 = vpop.f32.mrb[0].mxu0 }
  0xef   : > { %v437_v28 = vadd.f32 %v436_v27, %v1889_v25  ;;  %v516_v29 = vpop.f32.mrb[0].mxu1  ;;  %v438_v30 = vpop.f32.mrb[1].mxu0 }
  0xf0   : > { %v517_v31 = vadd.f32 %v516_v29, %v1889_v25  ;;  %v439_v32 = vadd.f32 %v438_v30, %v1891_v26  ;;  %v518_v33 = vpop.f32.mrb[1].mxu1  ;;  %v440_v34 = vpop.f32.mrb[2].mxu0 }
  0xf1   : > { %vm595_vm2 = vcmp.gt.f32.partialorder %v437_v28, 0.0  ;;  %v659_v35 = vmul.f32 0.1, %v437_v28  ;;  %v519_v36 = vadd.f32 %v518_v33, %v1891_v26  ;;  %v441_v37 = vadd.f32 %v440_v34, %v1889_v25  ;;  %v520_v38 = vpop.f32.mrb[2].mxu1  ;;  %v442_v39 = vpop.f32.mrb[3].mxu0 }
  0xf2   : > { %vm627_vm3 = vcmp.gt.f32.partialorder %v517_v31, 0.0  ;;  %v691_v40 = vmul.f32 0.1, %v517_v31  ;;  %vm596_vm4 = vcmp.gt.f32.partialorder %v439_v32, 0.0  ;;  %v660_v41 = vmul.f32 0.1, %v439_v32 }
  0xf3   : > { %vm628_vm5 = vcmp.gt.f32.partialorder %v519_v36, 0.0  ;;  %v692_v42 = vmul.f32 0.1, %v519_v36  ;;  %vm597_vm6 = vcmp.gt.f32.partialorder %v441_v37, 0.0  ;;  %v522_v43 = vpop.f32.mrb[3].mxu1  ;;  %v723_v44 = vsel %vm595_vm2, %v437_v28, %v659_v35 }
  0xf4   : > { %v661_v45 = vmul.f32 0.1, %v441_v37  ;;  %v521_v46 = vadd.f32 %v520_v38, %v1889_v25  ;;  %v755_v47 = vsel %vm627_vm3, %v517_v31, %v691_v40  ;;  %v724_v48 = vsel %vm596_vm4, %v439_v32, %v660_v41 }
  0xf5   : > { %v443_v49 = vadd.f32 %v442_v39, %v1891_v26  ;;  %v523_v50 = vadd.f32 %v522_v43, %v1891_v26  ;;  %v756_v51 = vsel %vm628_vm5, %v519_v36, %v692_v42 }
  0xf6   : > { %v725_v52 = vsel %vm597_vm6, %v441_v37, %v661_v45  ;;  %vm629_vm7 = vcmp.gt.f32.partialorder %v521_v46, 0.0  ;;  %v693_v53 = vmul.f32 0.1, %v521_v46  ;;  %v446_v54 = vpop.f32.mrb[4].mxu0 }
  0xf7   : > { %v1419_v55 = vpack.c.bf16 %v725_v52, %v723_v44  ;;  %vm598_vm8 = vcmp.gt.f32.partialorder %v443_v49, 0.0  ;;  %v662_v56 = vmul.f32 0.1, %v443_v49  ;;  %vm630_vm9 = vcmp.gt.f32.partialorder %v523_v50, 0.0  ;;  %v526_v57 = vpop.f32.mrb[4].mxu1  ;;  %v448_v58 = vpop.f32.mrb[5].mxu0 }
  0xf8   : > { %v757_v59 = vsel %vm629_vm7, %v521_v46, %v693_v53  ;;  %v694_v60 = vmul.f32 0.1, %v523_v50  ;;  %v447_v61 = vadd.f32 %v446_v54, %v1889_v25  ;;  %v527_v62 = vadd.f32 %v526_v57, %v1889_v25  ;;  %v528_v63 = vpop.f32.mrb[5].mxu1  ;;  %v450_v0 = vpop.f32.mrb[6].mxu0 }
  0xf9   : > { %1420 = vst [vmem:[%s1909_s12] sm:$0xff] %v1419_v55   ;;  %v1459_v1 = vpack.c.bf16 %v757_v59, %v755_v47  ;;  %v726_v2 = vsel %vm598_vm8, %v443_v49, %v662_v56  ;;  %v449_v3 = vadd.f32 %v448_v58, %v1891_v26  ;;  %v529_v4 = vadd.f32 %v528_v63, %v1891_v26  ;;  %v530_v5 = vpop.f32.mrb[6].mxu1  ;;  %v452_v6 = vpop.f32.mrb[7].mxu0 }
  0xfa   : > { %v1499_v7 = vpack.c.bf16 %v726_v2, %v724_v48  ;;  %v758_v8 = vsel %vm630_vm9, %v523_v50, %v694_v60  ;;  %vm599_vm10 = vcmp.gt.f32.partialorder %v447_v61, 0.0  ;;  %v663_v9 = vmul.f32 0.1, %v447_v61  ;;  %v532_v10 = vpop.f32.mrb[7].mxu1 }
  0xfb   : > { %1583 = vst [vmem:[%s1909_s12 + $0x40] sm:$0xff] %v1459_v1   ;;  %v1539_v11 = vpack.c.bf16 %v758_v8, %v756_v51  ;;  %vm631_vm11 = vcmp.gt.f32.partialorder %v527_v62, 0.0  ;;  %v695_v12 = vmul.f32 0.1, %v527_v62  ;;  %vm600_vm12 = vcmp.gt.f32.partialorder %v449_v3, 0.0 }
  0xfc   : > { %1500 = vst [vmem:[%s1918_s13] sm:$0xff] %v1499_v7   ;;  %v727_v13 = vsel %vm599_vm10, %v447_v61, %v663_v9  ;;  %v664_v14 = vmul.f32 0.1, %v449_v3  ;;  %v696_v15 = vmul.f32 0.1, %v529_v4  ;;  %v451_v16 = vadd.f32 %v450_v0, %v1889_v25 }
  0xfd   : > { %1598 = vst [vmem:[%s1918_s13 + $0x40] sm:$0xff] %v1539_v11   ;;  %v531_v17 = vadd.f32 %v530_v5, %v1889_v25  ;;  %v453_v18 = vadd.f32 %v452_v6, %v1891_v26  ;;  %v759_v19 = vsel %vm631_vm11, %v527_v62, %v695_v12  ;;  %vm632_vm13 = vcmp.gt.f32.partialorder %v529_v4, 0.0 }
  0xfe   : > { %v728_v20 = vsel %vm600_vm12, %v449_v3, %v664_v14  ;;  %v533_v21 = vadd.f32 %v532_v10, %v1891_v26  ;;  %v456_v22 = vpop.f32.mrb[8].mxu0  ;;  %vm601_vm14 = vcmp.gt.f32.partialorder %v451_v16, 0.0  ;;  %v665_v23 = vmul.f32 0.1, %v451_v16 }
  0xff   : > { %vm633_vm15 = vcmp.gt.f32.partialorder %v531_v17, 0.0  ;;  %v697_v24 = vmul.f32 0.1, %v531_v17  ;;  %vm602_vm0 = vcmp.gt.f32.partialorder %v453_v18, 0.0  ;;  %v666_v27 = vmul.f32 0.1, %v453_v18 }
 0x100   : > { %vm634_vm1 = vcmp.gt.f32.partialorder %v533_v21, 0.0  ;;  %v698_v28 = vmul.f32 0.1, %v533_v21  ;;  %v760_v29 = vsel %vm632_vm13, %v529_v4, %v696_v15  ;;  %v729_v30 = vsel %vm601_vm14, %v451_v16, %v665_v23  ;;  %v536_v33 = vpop.f32.mrb[8].mxu1  ;;  %v458_v34 = vpop.f32.mrb[9].mxu0 }
 0x101   : > { %v761_v31 = vsel %vm633_vm15, %v531_v17, %v697_v24  ;;  %v457_v32 = vadd.f32 %v456_v22, %v1889_v25  ;;  %v1424_v35 = vpack.c.bf16 %v729_v30, %v727_v13  ;;  %v730_v37 = vsel %vm602_vm0, %v453_v18, %v666_v27  ;;  %v538_v39 = vpop.f32.mrb[9].mxu1  ;;  %v460_v40 = vpop.f32.mrb[10].mxu0 }
 0x102   : > { %v1464_v36 = vpack.c.bf16 %v761_v31, %v759_v19  ;;  %v762_v38 = vsel %vm634_vm1, %v533_v21, %v698_v28  ;;  %v1504_v41 = vpack.c.bf16 %v730_v37, %v728_v20  ;;  %v540_v44 = vpop.f32.mrb[10].mxu1  ;;  %v462_v45 = vpop.f32.mrb[11].mxu0  ;;  %v537_v46 = vadd.f32 %v536_v33, %v1889_v25 }
 0x103   : > { %v1544_v42 = vpack.c.bf16 %v762_v38, %v760_v29  ;;  %vm603_vm2 = vcmp.gt.f32.partialorder %v457_v32, 0.0  ;;  %v667_v43 = vmul.f32 0.1, %v457_v32  ;;  %1576 = vst [vmem:[%s1909_s12 + $0x8] sm:$0xff] %v1424_v35   ;;  %v459_v47 = vadd.f32 %v458_v34, %v1891_v26  ;;  %v542_v50 = vpop.f32.mrb[11].mxu1 }
 0x104   : > { %1584 = vst [vmem:[%s1909_s12 + $0x48] sm:$0xff] %v1464_v36   ;;  %v539_v48 = vadd.f32 %v538_v39, %v1891_v26  ;;  %v461_v49 = vadd.f32 %v460_v40, %v1889_v25  ;;  %1591 = vst [vmem:[%s1918_s13 + $0x8] sm:$0xff] %v1504_v41   ;;  %v541_v52 = vadd.f32 %v540_v44, %v1889_v25  ;;  %vm635_vm3 = vcmp.gt.f32.partialorder %v537_v46, 0.0 }
 0x105   : > { %1599 = vst [vmem:[%s1918_s13 + $0x48] sm:$0xff] %v1544_v42   ;;  %v731_v51 = vsel %vm603_vm2, %v457_v32, %v667_v43  ;;  %v463_v53 = vadd.f32 %v462_v45, %v1891_v26  ;;  %v543_v54 = vadd.f32 %v542_v50, %v1891_v26  ;;  %v699_v55 = vmul.f32 0.1, %v537_v46 }
 0x106   : > { %vm604_vm4 = vcmp.gt.f32.partialorder %v459_v47, 0.0  ;;  %v668_v56 = vmul.f32 0.1, %v459_v47  ;;  %vm636_vm5 = vcmp.gt.f32.partialorder %v539_v48, 0.0  ;;  %v700_v57 = vmul.f32 0.1, %v539_v48 }
 0x107   : > { %vm605_vm6 = vcmp.gt.f32.partialorder %v461_v49, 0.0  ;;  %v669_v58 = vmul.f32 0.1, %v461_v49  ;;  %v763_v59 = vsel %vm635_vm3, %v537_v46, %v699_v55  ;;  %vm637_vm7 = vcmp.gt.f32.partialorder %v541_v52, 0.0  ;;  %v466_v62 = vpop.f32.mrb[12].mxu0  ;;  %v546_v63 = vpop.f32.mrb[12].mxu1 }
 0x108   : > { %v732_v60 = vsel %vm604_vm4, %v459_v47, %v668_v56  ;;  %v701_v61 = vmul.f32 0.1, %v541_v52  ;;  %v764_v0 = vsel %vm636_vm5, %v539_v48, %v700_v57  ;;  %vm606_vm8 = vcmp.gt.f32.partialorder %v463_v53, 0.0  ;;  %v468_v3 = vpop.f32.mrb[13].mxu0  ;;  %v548_v4 = vpop.f32.mrb[13].mxu1 }
 0x109   : > { %v733_v1 = vsel %vm605_vm6, %v461_v49, %v669_v58  ;;  %v670_v2 = vmul.f32 0.1, %v463_v53  ;;  %vm638_vm9 = vcmp.gt.f32.partialorder %v543_v54, 0.0  ;;  %v702_v7 = vmul.f32 0.1, %v543_v54  ;;  %v470_v8 = vpop.f32.mrb[14].mxu0 }
 0x10a   : > { %v1429_v5 = vpack.c.bf16 %v733_v1, %v731_v51  ;;  %v765_v6 = vsel %vm637_vm7, %v541_v52, %v701_v61  ;;  %v550_v9 = vpop.f32.mrb[14].mxu1  ;;  %v467_v12 = vadd.f32 %v466_v62, %v1889_v25  ;;  %v547_v13 = vadd.f32 %v546_v63, %v1889_v25  ;;  %v472_v14 = vpop.f32.mrb[15].mxu0 }
 0x10b   : > { %v1469_v10 = vpack.c.bf16 %v765_v6, %v763_v59  ;;  %v734_v11 = vsel %vm606_vm8, %v463_v53, %v670_v2  ;;  %v552_v15 = vpop.f32.mrb[15].mxu1  ;;  %v766_v17 = vsel %vm638_vm9, %v543_v54, %v702_v7  ;;  %v469_v18 = vadd.f32 %v468_v3, %v1891_v26 }
 0x10c   : > { %1577 = vst [vmem:[%s1909_s12 + $0x10] sm:$0xff] %v1429_v5   ;;  %v1509_v16 = vpack.c.bf16 %v734_v11, %v732_v60  ;;  %v549_v19 = vadd.f32 %v548_v4, %v1891_v26  ;;  %v1549_v20 = vpack.c.bf16 %v766_v17, %v764_v0  ;;  %vm607_vm10 = vcmp.gt.f32.partialorder %v467_v12, 0.0 }
 0x10d   : > { %1585 = vst [vmem:[%s1909_s12 + $0x50] sm:$0xff] %v1469_v10   ;;  %v671_v21 = vmul.f32 0.1, %v467_v12  ;;  %vm639_vm11 = vcmp.gt.f32.partialorder %v547_v13, 0.0  ;;  %v703_v22 = vmul.f32 0.1, %v547_v13  ;;  %v471_v28 = vadd.f32 %v470_v8, %v1889_v25 }
 0x10e   : > { %1592 = vst [vmem:[%s1918_s13 + $0x10] sm:$0xff] %v1509_v16   ;;  %vm608_vm12 = vcmp.gt.f32.partialorder %v469_v18, 0.0  ;;  %v672_v23 = vmul.f32 0.1, %v469_v18  ;;  %vm640_vm13 = vcmp.gt.f32.partialorder %v549_v19, 0.0  ;;  %1600 = vst [vmem:[%s1918_s13 + $0x50] sm:$0xff] %v1549_v20   ;;  %v551_v29 = vadd.f32 %v550_v9, %v1889_v25 }
 0x10f   : > { %v735_v24 = vsel %vm607_vm10, %v467_v12, %v671_v21  ;;  %v704_v27 = vmul.f32 0.1, %v549_v19  ;;  %v476_v30 = vpop.f32.mrb[16].mxu0  ;;  %v556_v31 = vpop.f32.mrb[16].mxu1  ;;  %v767_v32 = vsel %vm639_vm11, %v547_v13, %v703_v22  ;;  %v473_v34 = vadd.f32 %v472_v14, %v1891_v26 }
 0x110   : > { %v736_v33 = vsel %vm608_vm12, %v469_v18, %v672_v23  ;;  %v553_v35 = vadd.f32 %v552_v15, %v1891_v26  ;;  %v478_v36 = vpop.f32.mrb[17].mxu0  ;;  %v558_v37 = vpop.f32.mrb[17].mxu1  ;;  %vm609_vm14 = vcmp.gt.f32.partialorder %v471_v28, 0.0  ;;  %v673_v39 = vmul.f32 0.1, %v471_v28 }
 0x111   : > { %v768_v38 = vsel %vm640_vm13, %v549_v19, %v704_v27  ;;  %vm641_vm15 = vcmp.gt.f32.partialorder %v551_v29, 0.0  ;;  %v480_v40 = vpop.f32.mrb[18].mxu0  ;;  %v560_v41 = vpop.f32.mrb[18].mxu1  ;;  %v705_v42 = vmul.f32 0.1, %v551_v29  ;;  %vm610_vm0 = vcmp.gt.f32.partialorder %v473_v34, 0.0 }
 0x112   : > { %v674_v43 = vmul.f32 0.1, %v473_v34  ;;  %vm642_vm1 = vcmp.gt.f32.partialorder %v553_v35, 0.0  ;;  %v737_v44 = vsel %vm609_vm14, %v471_v28, %v673_v39  ;;  %v706_v45 = vmul.f32 0.1, %v553_v35  ;;  %v482_v48 = vpop.f32.mrb[19].mxu0 }
 0x113   : > { %v477_v46 = vadd.f32 %v476_v30, %v1889_v25  ;;  %v557_v47 = vadd.f32 %v556_v31, %v1889_v25  ;;  %v562_v49 = vpop.f32.mrb[19].mxu1  ;;  %v1434_v50 = vpack.c.bf16 %v737_v44, %v735_v24  ;;  %v769_v51 = vsel %vm641_vm15, %v551_v29, %v705_v42 }
 0x114   : > { %v738_v52 = vsel %vm610_vm0, %v473_v34, %v674_v43  ;;  %v479_v53 = vadd.f32 %v478_v36, %v1891_v26  ;;  %v1474_v54 = vpack.c.bf16 %v769_v51, %v767_v32  ;;  %v770_v56 = vsel %vm642_vm1, %v553_v35, %v706_v45 }
 0x115   : > { %v1514_v55 = vpack.c.bf16 %v738_v52, %v736_v33  ;;  %vm611_vm2 = vcmp.gt.f32.partialorder %v477_v46, 0.0  ;;  %1578 = vst [vmem:[%s1909_s12 + $0x18] sm:$0xff] %v1434_v50   ;;  %v1554_v57 = vpack.c.bf16 %v770_v56, %v768_v38  ;;  %v675_v58 = vmul.f32 0.1, %v477_v46 }
 0x116   : > { %vm643_vm3 = vcmp.gt.f32.partialorder %v557_v47, 0.0  ;;  %v707_v59 = vmul.f32 0.1, %v557_v47  ;;  %v486_v60 = vpop.f32.mrb[20].mxu0  ;;  %1586 = vst [vmem:[%s1909_s12 + $0x58] sm:$0xff] %v1474_v54   ;;  %vm612_vm4 = vcmp.gt.f32.partialorder %v479_v53, 0.0  ;;  %v559_v62 = vadd.f32 %v558_v37, %v1891_v26 }
 0x117   : > { %1593 = vst [vmem:[%s1918_s13 + $0x18] sm:$0xff] %v1514_v55   ;;  %v676_v61 = vmul.f32 0.1, %v479_v53  ;;  %v481_v63 = vadd.f32 %v480_v40, %v1889_v25  ;;  %v566_v0 = vpop.f32.mrb[20].mxu1  ;;  %v488_v1 = vpop.f32.mrb[21].mxu0  ;;  %1601 = vst [vmem:[%s1918_s13 + $0x58] sm:$0xff] %v1554_v57   ;;  %v739_v2 = vsel %vm611_vm2, %v477_v46, %v675_v58  ;;  %v561_v4 = vadd.f32 %v560_v41, %v1889_v25 }
 0x118   : > { %v771_v3 = vsel %vm643_vm3, %v557_v47, %v707_v59  ;;  %v483_v5 = vadd.f32 %v482_v48, %v1891_v26  ;;  %v568_v6 = vpop.f32.mrb[21].mxu1  ;;  %v490_v7 = vpop.f32.mrb[22].mxu0  ;;  %vm644_vm5 = vcmp.gt.f32.partialorder %v559_v62, 0.0  ;;  %v708_v9 = vmul.f32 0.1, %v559_v62 }
 0x119   : > { %v740_v8 = vsel %vm612_vm4, %v479_v53, %v676_v61  ;;  %vm613_vm6 = vcmp.gt.f32.partialorder %v481_v63, 0.0  ;;  %v570_v10 = vpop.f32.mrb[22].mxu1  ;;  %v492_v11 = vpop.f32.mrb[23].mxu0  ;;  %v677_v12 = vmul.f32 0.1, %v481_v63  ;;  %vm645_vm7 = vcmp.gt.f32.partialorder %v561_v4, 0.0 }
 0x11a   : > { %v709_v13 = vmul.f32 0.1, %v561_v4  ;;  %vm614_vm8 = vcmp.gt.f32.partialorder %v483_v5, 0.0  ;;  %v772_v14 = vsel %vm644_vm5, %v559_v62, %v708_v9  ;;  %v678_v15 = vmul.f32 0.1, %v483_v5  ;;  %v572_v18 = vpop.f32.mrb[23].mxu1 }
 0x11b   : > { %v563_v16 = vadd.f32 %v562_v49, %v1891_v26  ;;  %v487_v17 = vadd.f32 %v486_v60, %v1889_v25  ;;  %v741_v19 = vsel %vm613_vm6, %v481_v63, %v677_v12  ;;  %v567_v21 = vadd.f32 %v566_v0, %v1889_v25 }
 0x11c   : > { %v773_v20 = vsel %vm645_vm7, %v561_v4, %v709_v13  ;;  %v489_v22 = vadd.f32 %v488_v1, %v1891_v26  ;;  %v1439_v23 = vpack.c.bf16 %v741_v19, %v739_v2  ;;  %v742_v27 = vsel %vm614_vm8, %v483_v5, %v678_v15 }
 0x11d   : > { %v1479_v24 = vpack.c.bf16 %v773_v20, %v771_v3  ;;  %vm646_vm9 = vcmp.gt.f32.partialorder %v563_v16, 0.0  ;;  %v1519_v28 = vpack.c.bf16 %v742_v27, %v740_v8  ;;  %v710_v29 = vmul.f32 0.1, %v563_v16 }
 0x11e   : > { %vm615_vm10 = vcmp.gt.f32.partialorder %v487_v17, 0.0  ;;  %v679_v30 = vmul.f32 0.1, %v487_v17  ;;  %v496_v31 = vpop.f32.mrb[24].mxu0  ;;  %1579 = vst [vmem:[%s1909_s12 + $0x20] sm:$0xff] %v1439_v23   ;;  %vm647_vm11 = vcmp.gt.f32.partialorder %v567_v21, 0.0  ;;  %v569_v36 = vadd.f32 %v568_v6, %v1891_v26 }
 0x11f   : > { %1587 = vst [vmem:[%s1909_s12 + $0x60] sm:$0xff] %v1479_v24   ;;  %v711_v32 = vmul.f32 0.1, %v567_v21  ;;  %vm616_vm12 = vcmp.gt.f32.partialorder %v489_v22, 0.0  ;;  %v680_v33 = vmul.f32 0.1, %v489_v22  ;;  %v774_v34 = vsel %vm646_vm9, %v563_v16, %v710_v29 }
 0x120   : > { %1594 = vst [vmem:[%s1918_s13 + $0x20] sm:$0xff] %v1519_v28   ;;  %v743_v35 = vsel %vm615_vm10, %v487_v17, %v679_v30  ;;  %v491_v37 = vadd.f32 %v490_v7, %v1889_v25  ;;  %v576_v38 = vpop.f32.mrb[24].mxu1  ;;  %v498_v39 = vpop.f32.mrb[25].mxu0  ;;  %v1559_v40 = vpack.c.bf16 %v774_v34, %v772_v14  ;;  %v571_v43 = vadd.f32 %v570_v10, %v1889_v25 }
 0x121   : > { %v775_v41 = vsel %vm647_vm11, %v567_v21, %v711_v32  ;;  %v744_v42 = vsel %vm616_vm12, %v489_v22, %v680_v33  ;;  %v578_v44 = vpop.f32.mrb[25].mxu1  ;;  %v500_v45 = vpop.f32.mrb[26].mxu0  ;;  %vm648_vm13 = vcmp.gt.f32.partialorder %v569_v36, 0.0  ;;  %v712_v46 = vmul.f32 0.1, %v569_v36 }
 0x122   : > { %vm617_vm14 = vcmp.gt.f32.partialorder %v491_v37, 0.0  ;;  %v681_v47 = vmul.f32 0.1, %v491_v37  ;;  %1602 = vst [vmem:[%s1918_s13 + $0x60] sm:$0xff] %v1559_v40   ;;  %vm649_vm15 = vcmp.gt.f32.partialorder %v571_v43, 0.0  ;;  %v493_v49 = vadd.f32 %v492_v11, %v1891_v26  ;;  %v580_v51 = vpop.f32.mrb[26].mxu1 }
 0x123   : > { %v713_v48 = vmul.f32 0.1, %v571_v43  ;;  %v573_v50 = vadd.f32 %v572_v18, %v1891_v26  ;;  %v502_v52 = vpop.f32.mrb[27].mxu0  ;;  %v776_v53 = vsel %vm648_vm13, %v569_v36, %v712_v46  ;;  %v497_v55 = vadd.f32 %v496_v31, %v1889_v25  ;;  %v582_v57 = vpop.f32.mrb[27].mxu1 }
 0x124   : > { %v745_v54 = vsel %vm617_vm14, %v491_v37, %v681_v47  ;;  %v577_v56 = vadd.f32 %v576_v38, %v1889_v25  ;;  %vm618_vm0 = vcmp.gt.f32.partialorder %v493_v49, 0.0  ;;  %v682_v60 = vmul.f32 0.1, %v493_v49 }
 0x125   : > { %v1444_v58 = vpack.c.bf16 %v745_v54, %v743_v35  ;;  %v777_v59 = vsel %vm649_vm15, %v571_v43, %v713_v48  ;;  %vm650_vm1 = vcmp.gt.f32.partialorder %v573_v50, 0.0  ;;  %v714_v62 = vmul.f32 0.1, %v573_v50 }
 0x126   : > { %v1484_v61 = vpack.c.bf16 %v777_v59, %v775_v41  ;;  %vm619_vm2 = vcmp.gt.f32.partialorder %v497_v55, 0.0  ;;  %v506_v63 = vpop.f32.mrb[28].mxu0  ;;  %v746_v0 = vsel %vm618_vm0, %v493_v49, %v682_v60  ;;  %v683_v1 = vmul.f32 0.1, %v497_v55 }
 0x127   : > { %1580 = vst [vmem:[%s1909_s12 + $0x28] sm:$0xff] %v1444_v58   ;;  %vm651_vm3 = vcmp.gt.f32.partialorder %v577_v56, 0.0  ;;  %v715_v2 = vmul.f32 0.1, %v577_v56  ;;  %v586_v3 = vpop.f32.mrb[28].mxu1  ;;  %v1524_v4 = vpack.c.bf16 %v746_v0, %v744_v42  ;;  %v778_v5 = vsel %vm650_vm1, %v573_v50, %v714_v62  ;;  %v508_v8 = vpop.f32.mrb[29].mxu0 }
 0x128   : > { %1588 = vst [vmem:[%s1909_s12 + $0x68] sm:$0xff] %v1484_v61   ;;  %v499_v6 = vadd.f32 %v498_v39, %v1891_v26  ;;  %v579_v7 = vadd.f32 %v578_v44, %v1891_v26  ;;  %v588_v9 = vpop.f32.mrb[29].mxu1  ;;  %v1564_v10 = vpack.c.bf16 %v778_v5, %v776_v53  ;;  %v747_v11 = vsel %vm619_vm2, %v497_v55, %v683_v1  ;;  %v510_v14 = vpop.f32.mrb[30].mxu0 }
 0x129   : > { %v779_v12 = vsel %vm651_vm3, %v577_v56, %v715_v2  ;;  %v501_v13 = vadd.f32 %v500_v45, %v1889_v25  ;;  %v590_v15 = vpop.f32.mrb[30].mxu1  ;;  %1595 = vst [vmem:[%s1918_s13 + $0x28] sm:$0xff] %v1524_v4   ;;  %v581_v19 = vadd.f32 %v580_v51, %v1889_v25  ;;  %v503_v20 = vadd.f32 %v502_v52, %v1891_v26  ;;  %v512_v21 = vpop.f32.mrb[31].mxu0 }
 0x12a   : > { %vm620_vm4 = vcmp.gt.f32.partialorder %v499_v6, 0.0  ;;  %v684_v16 = vmul.f32 0.1, %v499_v6  ;;  %vm652_vm5 = vcmp.gt.f32.partialorder %v579_v7, 0.0  ;;  %v716_v17 = vmul.f32 0.1, %v579_v7 }
 0x12b   : > { %1603 = vst [vmem:[%s1918_s13 + $0x68] sm:$0xff] %v1564_v10   ;;  %vm621_vm6 = vcmp.gt.f32.partialorder %v501_v13, 0.0  ;;  %v685_v18 = vmul.f32 0.1, %v501_v13  ;;  %v592_v22 = vpop.f32.mrb[31].mxu1  ;;  %v583_v27 = vadd.f32 %v582_v57, %v1891_v26  ;;  %v507_v28 = vadd.f32 %v506_v63, %v1889_v25 }
 0x12c   : > { %v748_v23 = vsel %vm620_vm4, %v499_v6, %v684_v16  ;;  %v780_v24 = vsel %vm652_vm5, %v579_v7, %v716_v17  ;;  %vm653_vm7 = vcmp.gt.f32.partialorder %v581_v19, 0.0  ;;  %v717_v30 = vmul.f32 0.1, %v581_v19 }
 0x12d   : > { %v749_v29 = vsel %vm621_vm6, %v501_v13, %v685_v18  ;;  %vm622_vm8 = vcmp.gt.f32.partialorder %v503_v20, 0.0  ;;  %v686_v32 = vmul.f32 0.1, %v503_v20  ;;  %vm654_vm9 = vcmp.gt.f32.partialorder %v583_v27, 0.0 }
 0x12e   : > { %v1449_v31 = vpack.c.bf16 %v749_v29, %v747_v11  ;;  %v718_v33 = vmul.f32 0.1, %v583_v27  ;;  %v781_v34 = vsel %vm653_vm7, %v581_v19, %v717_v30  ;;  %vm623_vm10 = vcmp.gt.f32.partialorder %v507_v28, 0.0 }
 0x12f   : > { %v687_v35 = vmul.f32 0.1, %v507_v28  ;;  %v587_v36 = vadd.f32 %v586_v3, %v1889_v25  ;;  %v1489_v37 = vpack.c.bf16 %v781_v34, %v779_v12  ;;  %v750_v38 = vsel %vm622_vm8, %v503_v20, %v686_v32 }
 0x130   : > { %1581 = vst [vmem:[%s1909_s12 + $0x30] sm:$0xff] %v1449_v31   ;;  %v782_v39 = vsel %vm654_vm9, %v583_v27, %v718_v33  ;;  %v509_v40 = vadd.f32 %v508_v8, %v1891_v26  ;;  %v1529_v41 = vpack.c.bf16 %v750_v38, %v748_v23  ;;  %v589_v45 = vadd.f32 %v588_v9, %v1891_v26 }
 0x131   : > { %v1569_v42 = vpack.c.bf16 %v782_v39, %v780_v24  ;;  %1589 = vst [vmem:[%s1909_s12 + $0x70] sm:$0xff] %v1489_v37   ;;  %v751_v43 = vsel %vm623_vm10, %v507_v28, %v687_v35  ;;  %v719_v44 = vmul.f32 0.1, %v587_v36  ;;  %v511_v46 = vadd.f32 %v510_v14, %v1889_v25 }
 0x132   : > { %1596 = vst [vmem:[%s1918_s13 + $0x30] sm:$0xff] %v1529_v41   ;;  %v591_v47 = vadd.f32 %v590_v15, %v1889_v25  ;;  %v513_v48 = vadd.f32 %v512_v21, %v1891_v26  ;;  %v593_v49 = vadd.f32 %v592_v22, %v1891_v26  ;;  %vm655_vm11 = vcmp.gt.f32.partialorder %v587_v36, 0.0 }
 0x133   : > { %1604 = vst [vmem:[%s1918_s13 + $0x70] sm:$0xff] %v1569_v42   ;;  %vm624_vm12 = vcmp.gt.f32.partialorder %v509_v40, 0.0  ;;  %v688_v50 = vmul.f32 0.1, %v509_v40  ;;  %v720_v51 = vmul.f32 0.1, %v589_v45  ;;  %v783_v25 = vsel %vm655_vm11, %v587_v36, %v719_v44 }
 0x134   : > { %vm625_vm13 = vcmp.gt.f32.partialorder %v511_v46, 0.0  ;;  %v689_v52 = vmul.f32 0.1, %v511_v46  ;;  %vm657_vm14 = vcmp.gt.f32.partialorder %v591_v47, 0.0  ;;  %v721_v53 = vmul.f32 0.1, %v591_v47 }
 0x135   : > { %vm656_vm15 = vcmp.gt.f32.partialorder %v589_v45, 0.0  ;;  %vm626_vm0 = vcmp.gt.f32.partialorder %v513_v48, 0.0  ;;  %v690_v54 = vmul.f32 0.1, %v513_v48  ;;  %vm658_vm1 = vcmp.gt.f32.partialorder %v593_v49, 0.0 }
 0x136   : > { %v753_v26 = vsel %vm625_vm13, %v511_v46, %v689_v52  ;;  %v785_v55 = vsel %vm657_vm14, %v591_v47, %v721_v53  ;;  %v722_v56 = vmul.f32 0.1, %v593_v49  ;;  %v752_v57 = vsel %vm624_vm12, %v509_v40, %v688_v50 }
 0x137   : > { %v1454_v58 = vpack.c.bf16 %v753_v26, %v751_v43  ;;  %v1494_v59 = vpack.c.bf16 %v785_v55, %v783_v25  ;;  %v754_v60 = vsel %vm626_vm0, %v513_v48, %v690_v54  ;;  %v784_v61 = vsel %vm656_vm15, %v589_v45, %v720_v51 }
 0x138   : > { %v1534_v62 = vpack.c.bf16 %v754_v60, %v752_v57  ;;  %v786_v63 = vsel %vm658_vm1, %v593_v49, %v722_v56 }
 0x139   : > { %1582 = vst [vmem:[%s1909_s12 + $0x38] sm:$0xff] %v1454_v58   ;;  %1590 = vst [vmem:[%s1909_s12 + $0x78] sm:$0xff] %v1494_v59   ;;  %v1574_v0 = vpack.c.bf16 %v786_v63, %v784_v61 }
 0x13a   : > { %1597 = vst [vmem:[%s1918_s13 + $0x38] sm:$0xff] %v1534_v62  }
 0x13b   : > { %1684 = shalt.err (!%p1681_p3)
}
 0x13c   : > { %s1685_s19 = scalar_lea.hbm %s2007_s27, 2048  ;;  %s1689_s22 = scalar_lea.hbm %s2100_s3, 4096 }
 0x13d   : > { %p1686_p4 = scmp.ne.s32.totalorder %s2007_s27, %s1685_s19  ;;  %p1690_p9 = scmp.lt.u32.totalorder %s2007_s27, %s2100_s3 }
 0x13e   : > { %p1691_p10 = scmp.lt.u32.totalorder %s1689_s22, %s1685_s19  ;;  %p1693_p12 = scmp.lt.u32.totalorder %s1685_s19, %s2007_s27 }
 0x13f   : > { %p1687_p7 = pnand %p1686_p4, %p1835_p5 }
 0x140   : > { %p1692_p11 = por %p1691_p10, %p1690_p9 }
 0x141   : > { %p1688_p8 = pneg %p1687_p7 }
 0x142   : > { %p1694_p13 = por %p1693_p12, %p1692_p11 }
 0x144   : > { %p1695_p0 = pnand %p1694_p13, %p1688_p8 }
 0x146   : > { %1698 = shalt.err (!%p1695_p0)
}
 0x147   : > { %s1769_s30 = smov 64   ;;  %s1770_s7 = smov 4   ;;  %1605 = vst [vmem:[%s1918_s13 + $0x78] sm:$0xff] %v1574_v0  }
 0x148   : > { %1608 = dma.vmem_to_hbm [thread:$0]  (%p1835_p5), %s2009_s20, 2048, %s2007_s27, %s1108_s6, %s1769_s30, %s1769_s30, %s1770_s7  }
 0x149   : > { %s1113_s8 = scalar_lea.sflag [#allocation5], %s1897_s10  ;;  %s1699_s9 = scalar_lea.vmem %s2022_s28, 2048 }
 0x14a   : > { %p1700_p1 = scmp.ne.s32.totalorder %s2022_s28, %s1699_s9  ;;  %s1771_s11 = smov [#allocation4]  }
 0x14b   : > { %s1703_s19 = sshll.u32 %s1771_s11, 4  ;;  %s1704_s19 = int_to_ptr.vmem [resolvable:$false] %s1703_s19 }
 0x14c   : > { %p1701_p2 = pnand %p1700_p1, %p1835_p5  ;;  %s1705_s12 = scalar_lea.vmem %s1704_s19, 4096 }
 0x14d   : > { %p1706_p4 = scmp.lt.s32.totalorder %s2022_s28, %s1704_s19  ;;  %p1707_p7 = scmp.lt.s32.totalorder %s1705_s12, %s1699_s9 }
 0x14e   : > { %p1702_p3 = pneg %p1701_p2 }
 0x14f   : > { %p1708_p8 = por %p1707_p7, %p1706_p4 }
 0x151   : > { %p1709_p9 = pnand %p1708_p8, %p1702_p3 }
 0x153   : > { %1712 = shalt.err (!%p1709_p9)
}
 0x154   : > { %s1713_s13 = scalar_lea.hbm %s2020_s5, 2048  ;;  %s1717_s6 = scalar_lea.hbm %s2101_s4, 4096 }
 0x155   : > { %p1714_p10 = scmp.ne.s32.totalorder %s2020_s5, %s1713_s13  ;;  %p1718_p13 = scmp.lt.u32.totalorder %s2020_s5, %s2101_s4 }
 0x156   : > { %p1719_p0 = scmp.lt.u32.totalorder %s1717_s6, %s1713_s13  ;;  %p1721_p2 = scmp.lt.u32.totalorder %s1713_s13, %s2020_s5 }
 0x157   : > { %p1715_p11 = pnand %p1714_p10, %p1835_p5 }
 0x158   : > { %p1720_p1 = por %p1719_p0, %p1718_p13 }
 0x159   : > { %p1716_p12 = pneg %p1715_p11 }
 0x15a   : > { %p1722_p3 = por %p1721_p2, %p1720_p1 }
 0x15c   : > { %p1723_p4 = pnand %p1722_p3, %p1716_p12 }
 0x15e   : > { %1726 = shalt.err (!%p1723_p4)
}
 0x15f   : > { %1609 = dma.vmem_to_hbm [thread:$0]  (%p1835_p5), %s2022_s28, 2048, %s2020_s5, %s1113_s8, %s1769_s30, %s1769_s30, %s1770_s7  }
 0x160 PF: > { %p1619_p7 = scmp.ge.s32.totalorder %s1765_s18, 2  ;;  %s1157_s23 = sand.u32 1, %s1753_s15  }
 0x161   : > { %s1158_s29 = scalar_lea.sflag [#allocation3], %s1157_s23 }
 0x162   : > { %p1613_p8 = pnand %p1619_p7, %p1839_p6 }
 0x164   : > { %1744 = dma.done.wait (!%p1613_p8), %s1158_s29, 2048  }
 0x165   : > { %1746 = vsyncadd (!%p1613_p8), %s1158_s29, 4294965248  ;;  %s1167_s25 = scalar_lea.sflag [#allocation5], %s1157_s23 }
 0x166   : > { %1748 = dma.done.wait (!%p1613_p8), %s1167_s25, 2048  }
 0x167   : > { %1750 = vsyncadd (!%p1613_p8), %s1167_s25, 4294965248  ;;  %p18_p5 = scmp.ge.s32.totalorder %s1822_s21, 4   ;;  %s2104_s15 = smov %s1757_s16 }
 0x168   : > { %s2105_s16 = smov %s1761_s17  ;;  %s2106_s17 = smov %s1833_s24 }
 0x169   : > { %s2107_s18 = smov %s1822_s21  ;;  %20 = sbr.rel (!%p18_p5) target bundleno = 5 (0x5), region = 84 }
 0x170   :  { %1172 = vsyncpa [#allocation3], 1 }
 0x171   :  { %1174 = vsyncpa [#allocation3 + $0x1], 1 }
 0x172   :  { %1175 = vsyncpa [#allocation5], 1 }
 0x173   :  { %1177 = vsyncpa [#allocation5 + $0x1], 1 }

</bundles_post_ra>
